<compile_context>
chip_gen: v5e
topology: v5e:2x2
jax: 0.10.0
libtpu: 0.0.40
codegen_flags: <defaults>
</compile_context>

<pallas_src>
import functools

import jax
import jax.numpy as jnp
from jax.experimental import pallas as pl
from jax.experimental.pallas import tpu as pltpu


def _cdiv(a, b):
    return -(-a // b)


def _round_up(x, m):
    return _cdiv(x, m) * m


def _mlp_gate_kernel(x_ref, w_ref, b_ref, g_ref, beta_ref, o_ref, acc_ref,
                     *, eps, out_dim, tn, num_n):
    """Fused Linear -> LayerNorm -> Sigmoid.

    Grid: (row tiles, K tiles, N tiles). acc_ref is a persistent (tm, O) f32
    scratch; each (k, n) step adds x_tile @ w_tile into its column slab, and
    the LayerNorm + sigmoid epilogue runs once at the last (k, n) step.
    """
    k = pl.program_id(1)
    n = pl.program_id(2)

    @pl.when((k == 0) & (n == 0))
    def _():
        acc_ref[...] = jnp.zeros_like(acc_ref)

    # MXU matmul in the native input dtype, accumulated in f32.
    part = jnp.dot(x_ref[...], w_ref[...], preferred_element_type=jnp.float32)
    if num_n == 1:
        acc_ref[...] += part
    else:
        col = pl.multiple_of(n * tn, tn)
        acc_ref[:, pl.ds(col, tn)] += part

    @pl.when((k == pl.num_programs(1) - 1) & (n == pl.num_programs(2) - 1))
    def _():
        h = acc_ref[...] + b_ref[...].astype(jnp.float32)

        # LayerNorm over the (unpadded) last axis.  Two-pass variance on the
        # already-resident h avoids E[h^2]-u^2 cancellation; the clamp keeps
        # the rsqrt argument non-negative.
        inv_o = 1.0 / out_dim
        u = jnp.sum(h, axis=-1, keepdims=True) * inv_o
        d = h - u
        var = jnp.maximum(jnp.sum(d * d, axis=-1, keepdims=True) * inv_o, 0.0)
        inv_std = jax.lax.rsqrt(var + eps)          # EUP rsqrt, no divide
        y = (g_ref[...].astype(jnp.float32) * (d * inv_std)
             + beta_ref[...].astype(jnp.float32))

        # Sigmoid gate.
        o_ref[...] = jax.nn.sigmoid(y).astype(o_ref.dtype)


def mlp_gate(hidden_states, w, b, gamma, beta, *, eps=1e-5):
    """hidden_states: (..., H); w: (H, O); b, gamma, beta: (O,)."""
    orig_shape = hidden_states.shape
    H = orig_shape[-1]
    O = w.shape[1]
    out_dtype = hidden_states.dtype

    x2d = hidden_states.reshape(-1, H)
    M = x2d.shape[0]

    in_bytes = jnp.dtype(x2d.dtype).itemsize
    w_bytes = jnp.dtype(w.dtype).itemsize
    out_bytes = jnp.dtype(out_dtype).itemsize
    p_bytes = jnp.dtype(b.dtype).itemsize

    # Row-tile (sublane) alignment follows the input packing (f32/bf16/8-bit).
    align = {4: 8, 2: 16, 1: 32}.get(in_bytes, 8)

    # K tile: prefer multiples of 256 (v6e/v7x MXU width), then 128, else full H.
    tk = H
    for cand in (1024, 768, 512, 384, 256, 128):
        if H >= cand and H % cand == 0:
            tk = cand
            break

    # N (output-column) tile: only tile when O is large, so the streamed
    # double-buffered W block stays small and the VMEM budget can go to tm.
    tn = O
    if O >= 2048:
        for cand in (1024, 512, 256):
            if O % cand == 0:
                tn = cand
                break

    # VMEM working-set budget (~48 MiB).  Components:
    #   2*tm*tk  x (double-buffered)     2*tk*tn  W (double-buffered)
    #   2*tm*O   out (double-buffered)   tm*O*4   f32 accumulator scratch
    #   6*O      bias / gamma / beta
    budget = 48 * 1024 * 1024
    fixed = 2 * tk * tn * w_bytes + 6 * O * p_bytes
    per_row = 2 * tk * in_bytes + 2 * O * out_bytes + O * 4
    tm_cap = (budget - fixed) // per_row
    tm_cap = max(align, min(1024, (tm_cap // align) * align))

    # Balance row tiles (no padding of M, no near-empty last tile) and keep
    # >= 2 row tiles for megacore / dual-TensorCore (v7x) when M is large.
    tm = min(tm_cap, _round_up(M, align))
    num_m = _cdiv(M, tm)
    if M >= 512 and num_m < 2:
        num_m = 2
    tm = min(tm, _round_up(_cdiv(M, num_m), align))
    num_m = _cdiv(M, tm)
    num_k = H // tk
    num_n = O // tn

    usage = (2 * tm * tk * in_bytes + 2 * tk * tn * w_bytes
             + 2 * tm * O * out_bytes + tm * O * 4 + 6 * O * p_bytes)
    vmem_limit = int(min(128 * 1024 * 1024,
                         max(16 * 1024 * 1024, usage * 1.15 + (1 << 20))))

    kernel = functools.partial(_mlp_gate_kernel, eps=eps, out_dim=O,
                               tn=tn, num_n=num_n)

    out2d = pl.pallas_call(
        kernel,
        out_shape=jax.ShapeDtypeStruct((M, O), out_dtype),
        grid=(num_m, num_k, num_n),
        in_specs=[
            pl.BlockSpec((tm, tk), lambda i, k, n: (i, k)),   # x row/K tile
            pl.BlockSpec((tk, tn), lambda i, k, n: (k, n)),   # W K/N tile
            pl.BlockSpec((1, O), lambda i, k, n: (0, 0)),     # linear bias
            pl.BlockSpec((1, O), lambda i, k, n: (0, 0)),     # LN weight
            pl.BlockSpec((1, O), lambda i, k, n: (0, 0)),     # LN bias
        ],
        out_specs=pl.BlockSpec((tm, O), lambda i, k, n: (i, 0)),
        scratch_shapes=[pltpu.VMEM((tm, O), jnp.float32)],
        compiler_params=pltpu.CompilerParams(
            dimension_semantics=("parallel", "arbitrary", "arbitrary"),
            vmem_limit_bytes=vmem_limit,
        ),
    )(x2d, w, b.reshape(1, O), gamma.reshape(1, O), beta.reshape(1, O))

    return out2d.reshape(*orig_shape[:-1], O)


def _reference(hidden_states, w, b, gamma, beta, eps=1e-5):
    h = jnp.einsum("...h,ho->...o", hidden_states.astype(jnp.float32),
                   w.astype(jnp.float32)) + b.astype(jnp.float32)
    u = jnp.mean(h, axis=-1, keepdims=True)
    s = jnp.mean((h - u) ** 2, axis=-1, keepdims=True)
    hn = (h - u) / jnp.sqrt(s + eps)
    return jax.nn.sigmoid(gamma * hn + beta)


if __name__ == "__main__":
    key = jax.random.PRNGKey(0)
    k_x, k_w, k_b, k_x2, k_w2, k_b2 = jax.random.split(key, 6)

    # --- Primary check: shapes implied by the module (batch=2, seq=8, hidden=32).
    B, S, H, O = 2, 8, 32, 32  # out_features defaults to hidden_size
    x = jax.random.normal(k_x, (B, S, H), dtype=jnp.float32)
    bound = 1.0 / (H ** 0.5)
    w = jax.random.uniform(k_w, (H, O), minval=-bound, maxval=bound, dtype=jnp.float32)
    b = jax.random.uniform(k_b, (O,), minval=-bound, maxval=bound, dtype=jnp.float32)
    gamma = jnp.ones((O,), dtype=jnp.float32)   # LayerNorm weight
    beta = jnp.zeros((O,), dtype=jnp.float32)   # LayerNorm bias

    out = jax.block_until_ready(mlp_gate(x, w, b, gamma, beta))
    ref = _reference(x, w, b, gamma, beta)
    assert out.shape == (B, S, O)
    assert jnp.allclose(out, ref, atol=1e-3, rtol=1e-3), "mismatch vs reference (small)"

    # --- Secondary check: ragged row count + multi-step K reduction path.
    B2, S2, H2, O2 = 3, 7, 640, 384
    x2 = jax.random.normal(k_x2, (B2, S2, H2), dtype=jnp.float32)
    bound2 = 1.0 / (H2 ** 0.5)
    w2 = jax.random.uniform(k_w2, (H2, O2), minval=-bound2, maxval=bound2,
                            dtype=jnp.float32)
    b2 = jax.random.uniform(k_b2, (O2,), minval=-bound2, maxval=bound2,
                            dtype=jnp.float32)
    gamma2 = jnp.ones((O2,), dtype=jnp.float32)
    beta2 = jnp.zeros((O2,), dtype=jnp.float32)

    out2 = jax.block_until_ready(mlp_gate(x2, w2, b2, gamma2, beta2))
    ref2 = _reference(x2, w2, b2, gamma2, beta2)
    assert out2.shape == (B2, S2, O2)
    assert jnp.allclose(out2, ref2, atol=1e-3, rtol=1e-3), "mismatch vs reference (ragged)"

    print("KERNEL_OK")
</pallas_src>

<mosaic_0001>
module attributes {stable_mosaic.version = 11 : i64} {
  func.func @_mlp_gate_kernel(%arg0: i32, %arg1: i32, %arg2: i32, %arg3: memref<16x32xf32, #tpu.memory_space<vmem>>, %arg4: memref<32x32xf32, #tpu.memory_space<vmem>>, %arg5: memref<1x32xf32, #tpu.memory_space<vmem>>, %arg6: memref<1x32xf32, #tpu.memory_space<vmem>>, %arg7: memref<1x32xf32, #tpu.memory_space<vmem>>, %arg8: memref<16x32xf32, #tpu.memory_space<vmem>>, %arg9: memref<16x32xf32, #tpu.memory_space<vmem>>) attributes {dimension_semantics = [#tpu.dimension_semantics<parallel>, #tpu.dimension_semantics<arbitrary>, #tpu.dimension_semantics<arbitrary>], iteration_bounds = array<i64: 1, 1, 1>, scalar_prefetch = 0 : i64, scratch_operands = 1 : i64, tpu.core_type = #tpu.core_type<tc>, window_params = [{transform_indices = @transform_0, window_bounds = array<i64: 16, 32>}, {transform_indices = @transform_1, window_bounds = array<i64: 32, 32>}, {pipeline_mode = #tpu.pipeline_mode<synchronous>, transform_indices = @transform_2, window_bounds = array<i64: 1, 32>}, {pipeline_mode = #tpu.pipeline_mode<synchronous>, transform_indices = @transform_3, window_bounds = array<i64: 1, 32>}, {pipeline_mode = #tpu.pipeline_mode<synchronous>, transform_indices = @transform_4, window_bounds = array<i64: 1, 32>}, {transform_indices = @transform_5, window_bounds = array<i64: 16, 32>}]} {
    %c0_i32 = arith.constant 0 : i32
    %0 = arith.cmpi eq, %arg1, %c0_i32 : i32
    %c0_i32_0 = arith.constant 0 : i32
    %1 = arith.cmpi eq, %arg2, %c0_i32_0 : i32
    %2 = arith.andi %0, %1 : i1
    %3 = arith.extui %2 : i1 to i32
    %c0_i32_1 = arith.constant 0 : i32
    %4 = arith.cmpi ne, %3, %c0_i32_1 : i32
    scf.if %4 {
      %cst_12 = arith.constant 0.000000e+00 : f32
      %16 = vector.broadcast %cst_12 : f32 to vector<16x32xf32>
      %c0_13 = arith.constant 0 : index
      %c0_14 = arith.constant 0 : index
      %17 = vector.load %arg9[%c0_13, %c0_14] : memref<16x32xf32, #tpu.memory_space<vmem>>, vector<16x32xf32>
      tpu.vector_store %arg9[%c0_13, %c0_14], %16 {strides = array<i32>} : memref<16x32xf32, #tpu.memory_space<vmem>>, vector<16x32xf32>,
    } else {
    }
    %c0 = arith.constant 0 : index
    %c0_2 = arith.constant 0 : index
    %5 = vector.load %arg3[%c0, %c0_2] : memref<16x32xf32, #tpu.memory_space<vmem>>, vector<16x32xf32>
    %c0_3 = arith.constant 0 : index
    %c0_4 = arith.constant 0 : index
    %6 = vector.load %arg4[%c0_3, %c0_4] : memref<32x32xf32, #tpu.memory_space<vmem>>, vector<32x32xf32>
    %cst = arith.constant dense<0.000000e+00> : vector<16x32xf32>
    %7 = tpu.matmul %5, %6, %cst {dimension_numbers = #tpu.dot_dimension_numbers<[1], [0], [0], [1], [0, 0, 1, 1], [], []>} : vector<16x32xf32>, vector<32x32xf32>, vector<16x32xf32> -> vector<16x32xf32>
    %c0_5 = arith.constant 0 : index
    %c0_6 = arith.constant 0 : index
    %8 = vector.load %arg9[%c0_5, %c0_6] : memref<16x32xf32, #tpu.memory_space<vmem>>, vector<16x32xf32>
    %9 = arith.addf %8, %7 : vector<16x32xf32>
    %c0_7 = arith.constant 0 : index
    %c0_8 = arith.constant 0 : index
    %10 = vector.load %arg9[%c0_7, %c0_8] : memref<16x32xf32, #tpu.memory_space<vmem>>, vector<16x32xf32>
    tpu.vector_store %arg9[%c0_7, %c0_8], %9 {strides = array<i32>} : memref<16x32xf32, #tpu.memory_space<vmem>>, vector<16x32xf32>,
    %c0_i32_9 = arith.constant 0 : i32
    %11 = arith.cmpi eq, %arg1, %c0_i32_9 : i32
    %c0_i32_10 = arith.constant 0 : i32
    %12 = arith.cmpi eq, %arg2, %c0_i32_10 : i32
    %13 = arith.andi %11, %12 : i1
    %14 = arith.extui %13 : i1 to i32
    %c0_i32_11 = arith.constant 0 : i32
    %15 = arith.cmpi ne, %14, %c0_i32_11 : i32
    scf.if %15 {
      %c0_12 = arith.constant 0 : index
      %c0_13 = arith.constant 0 : index
      %16 = vector.load %arg9[%c0_12, %c0_13] : memref<16x32xf32, #tpu.memory_space<vmem>>, vector<16x32xf32>
      %c0_14 = arith.constant 0 : index
      %c0_15 = arith.constant 0 : index
      %17 = vector.load %arg5[%c0_14, %c0_15] : memref<1x32xf32, #tpu.memory_space<vmem>>, vector<1x32xf32>
      %18 = vector.broadcast %17 : vector<1x32xf32> to vector<16x32xf32>
      %19 = arith.addf %16, %18 : vector<16x32xf32>
      %cst_16 = arith.constant dense<0.000000e+00> : vector<16xf32>
      %20 = vector.multi_reduction <add>, %19, %cst_16 [1] : vector<16x32xf32> to vector<16xf32>
      %21 = vector.shape_cast %20 : vector<16xf32> to vector<16x1xf32>
      %cst_17 = arith.constant 3.125000e-02 : f32
      %22 = vector.broadcast %cst_17 : f32 to vector<16x1xf32>
      %23 = arith.mulf %21, %22 : vector<16x1xf32>
      %24 = vector.broadcast %23 : vector<16x1xf32> to vector<16x32xf32>
      %25 = arith.subf %19, %24 : vector<16x32xf32>
      %26 = arith.mulf %25, %25 : vector<16x32xf32>
      %cst_18 = arith.constant dense<0.000000e+00> : vector<16xf32>
      %27 = vector.multi_reduction <add>, %26, %cst_18 [1] : vector<16x32xf32> to vector<16xf32>
      %28 = vector.shape_cast %27 : vector<16xf32> to vector<16x1xf32>
      %cst_19 = arith.constant 3.125000e-02 : f32
      %29 = vector.broadcast %cst_19 : f32 to vector<16x1xf32>
      %30 = arith.mulf %28, %29 : vector<16x1xf32>
      %cst_20 = arith.constant 0.000000e+00 : f32
      %31 = vector.broadcast %cst_20 : f32 to vector<16x1xf32>
      %32 = arith.maximumf %30, %31 : vector<16x1xf32>
      %cst_21 = arith.constant 9.99999974E-6 : f32
      %33 = vector.broadcast %cst_21 : f32 to vector<16x1xf32>
      %34 = arith.addf %32, %33 : vector<16x1xf32>
      %35 = math.rsqrt %34 : vector<16x1xf32>
      %c0_22 = arith.constant 0 : index
      %c0_23 = arith.constant 0 : index
      %36 = vector.load %arg6[%c0_22, %c0_23] : memref<1x32xf32, #tpu.memory_space<vmem>>, vector<1x32xf32>
      %37 = vector.broadcast %35 : vector<16x1xf32> to vector<16x32xf32>
      %38 = arith.mulf %25, %37 : vector<16x32xf32>
      %39 = vector.broadcast %36 : vector<1x32xf32> to vector<16x32xf32>
      %40 = arith.mulf %39, %38 : vector<16x32xf32>
      %c0_24 = arith.constant 0 : index
      %c0_25 = arith.constant 0 : index
      %41 = vector.load %arg7[%c0_24, %c0_25] : memref<1x32xf32, #tpu.memory_space<vmem>>, vector<1x32xf32>
      %42 = vector.broadcast %41 : vector<1x32xf32> to vector<16x32xf32>
      %43 = arith.addf %40, %42 : vector<16x32xf32>
      %44 = arith.negf %43 : vector<16x32xf32>
      %45 = math.exp %44 : vector<16x32xf32>
      %cst_26 = arith.constant 1.000000e+00 : f32
      %46 = vector.broadcast %cst_26 : f32 to vector<16x32xf32>
      %47 = arith.addf %46, %45 : vector<16x32xf32>
      %48 = arith.divf %46, %47 : vector<16x32xf32>
      %c0_27 = arith.constant 0 : index
      %c0_28 = arith.constant 0 : index
      %49 = vector.load %arg8[%c0_27, %c0_28] : memref<16x32xf32, #tpu.memory_space<vmem>>, vector<16x32xf32>
      tpu.vector_store %arg8[%c0_27, %c0_28], %48 {strides = array<i32>} : memref<16x32xf32, #tpu.memory_space<vmem>>, vector<16x32xf32>,
    } else {
    }
    return
  }
  func.func @transform_0(%arg0: i32, %arg1: i32, %arg2: i32) -> (i32, i32) {
    %c0_i32 = arith.constant 0 : i32
    return %arg0, %arg1 : i32, i32
  }
  func.func @transform_1(%arg0: i32, %arg1: i32, %arg2: i32) -> (i32, i32) {
    %c0_i32 = arith.constant 0 : i32
    return %arg1, %arg2 : i32, i32
  }
  func.func @transform_2(%arg0: i32, %arg1: i32, %arg2: i32) -> (i32, i32) {
    %c0_i32 = arith.constant 0 : i32
    %c0_i32_0 = arith.constant 0 : i32
    %c0_i32_1 = arith.constant 0 : i32
    return %c0_i32, %c0_i32_0 : i32, i32
  }
  func.func @transform_3(%arg0: i32, %arg1: i32, %arg2: i32) -> (i32, i32) {
    %c0_i32 = arith.constant 0 : i32
    %c0_i32_0 = arith.constant 0 : i32
    %c0_i32_1 = arith.constant 0 : i32
    return %c0_i32, %c0_i32_0 : i32, i32
  }
  func.func @transform_4(%arg0: i32, %arg1: i32, %arg2: i32) -> (i32, i32) {
    %c0_i32 = arith.constant 0 : i32
    %c0_i32_0 = arith.constant 0 : i32
    %c0_i32_1 = arith.constant 0 : i32
    return %c0_i32, %c0_i32_0 : i32, i32
  }
  func.func @transform_5(%arg0: i32, %arg1: i32, %arg2: i32) -> (i32, i32) {
    %c0_i32 = arith.constant 0 : i32
    %c0_i32_0 = arith.constant 0 : i32
    return %arg0, %c0_i32 : i32, i32
  }
}

</mosaic_0001>

<bundles_post_ra>
// kernel: tpu_custom_call.1
= control target key start
LH: loop header
LB: loop body
LE: loop exit
PB: predicated region body
PF: predicated region fallthrough
CT: control target
= control target key end

     0   :  { %10 = vsyncpa [#allocation4], 0  ;;  %s414_s0 = inlined_call_operand.hbm [shape: f32[16,32], index: 0, kind: input, shape index: {}]   ;;  %s415_s1 = inlined_call_operand.hbm [shape: f32[32,32], index: 1, kind: input, shape index: {}]   ;;  %s416_s2 = inlined_call_operand.vmem [shape: f32[1,32], index: 2, kind: input, shape index: {}]   ;;  %s417_s3 = inlined_call_operand.vmem [shape: f32[1,32], index: 3, kind: input, shape index: {}]   ;;  %s418_s4 = inlined_call_operand.vmem [shape: f32[1,32], index: 4, kind: input, shape index: {}]   ;;  %s419_s5 = inlined_call_operand.hbm [shape: f32[16,32], index: 5, kind: output, shape index: {}]  }
   0x1   :  { %11 = vsyncpa [#allocation7], 0 }
   0x2   :  { %12 = vsyncpa [#allocation5], 0  ;;  %s17_s20 = sshll.u32 %s414_s0, 4  ;;  %s339_s21 = smov [#allocation3]   ;;  %s18_s20 = int_to_ptr.hbm [resolvable:$true] %s17_s20 }
   0x3   :  { %s19_s22 = sshll.u32 %s339_s21, 4  ;;  %s30_s25 = sshll.u32 %s415_s1, 4  ;;  %s20_s22 = int_to_ptr.vmem [resolvable:$true] %s19_s22  ;;  %s31_s25 = int_to_ptr.hbm [resolvable:$true] %s30_s25 }
   0x4   :  { %s340_s26 = smov 128   ;;  %s341_s27 = smov 8  }
   0x5   :  { %25 = dma.hbm_to_vmem [thread:$0]  %s18_s20, 256, %s20_s22, [#allocation4], %s340_s26, %s340_s26, %s341_s27  }
   0x6   :  { %s342_s28 = smov [#allocation6]  }
   0x7   :  { %s32_s29 = sshll.u32 %s342_s28, 4  ;;  %s33_s29 = int_to_ptr.vmem [resolvable:$true] %s32_s29 }
   0x8   :  { %38 = dma.hbm_to_vmem [thread:$0]  %s31_s25, 512, %s33_s29, [#allocation7], %s340_s26, %s340_s26, %s341_s27  }
   0x9   :  { %333 = dma.done.wait [#allocation4], 256  }
   0xa   :  { %334 = vsyncadd [#allocation4], 4294967040 }
   0xb   :  { %335 = dma.done.wait [#allocation7], 512  }
   0xc   :  { %336 = vsyncadd [#allocation7], 4294966784  ;;  %vm59_vm0 = vcmask 261120   ;;  %v343_v0 = vmov 0.0   ;;  %v67_v1 = vld [vmem:[#allocation6 + $0x18] sm:$0xff]  ;;  %v66_v2 = vld [vmem:[#allocation6 + $0x10] sm:$0xff] }
   0xd   :  { %60 = vst.msk [vmem:[#allocation2] sm:$0xff] %vm59_vm0, %v343_v0  ;;  %87 = vmatpush.msra.mxu0 %v67_v1  ;;  %v65_v3 = vld [vmem:[#allocation6 + $0x8] sm:$0xff]  ;;  %236 = vmatpush.msra.mxu1 %v67_v1  ;;  %v64_v4 = vld [vmem:[#allocation6] sm:$0xff]  ;;  %v62_v5 = vld [vmem:[#allocation3] sm:$0xff]  ;;  %s218_s10 = sshll.u32 %s419_s5, 4  ;;  %s219_s10 = int_to_ptr.hbm [resolvable:$true] %s218_s10 }
   0xe   :  { %61 = vst.msk [vmem:[#allocation2 + $0x8] sm:$0xff] %vm59_vm0, %v343_v0  ;;  %v63_v6 = vld [vmem:[#allocation3 + $0x8] sm:$0xff]  ;;  %v246_v13 = vld [vmem:[%s416_s2] ss:$0 sm:$0xff] }
   0xf   :  { %88 = vmatpush.msra.mxu0 %v66_v2  ;;  %237 = vmatpush.msra.mxu1 %v66_v2  ;;  %v247_v46 = vld [vmem:[%s417_s3] ss:$0 sm:$0xff]  ;;  %s344_s3 = smov [#allocation8]  }
  0x10   :  { %v248_v49 = vld [vmem:[%s418_s4] ss:$0 sm:$0xff]  ;;  %s216_s4 = sshll.u32 %s344_s3, 4  ;;  %s217_s4 = int_to_ptr.vmem [resolvable:$true] %s216_s4 }
  0x11   :  { %89 = vmatpush.msra.mxu0 %v65_v3  ;;  %238 = vmatpush.msra.mxu1 %v65_v3 }
  0x13   :  { %90 = vmatpush.msra.mxu0 %v64_v4  ;;  %239 = vmatpush.msra.mxu1 %v64_v4 }
  0x14   :  { %232 = vmatmul.msk.f32.vlgmr.msra.gmra.mxu0 %vm59_vm0, %v62_v5  ;;  %233 = vmatmul.msk.f32.vlgmr.msra.gmra.mxu1 %vm59_vm0, %v63_v6  ;;  %v98_v7 = vld [vmem:[#allocation2] sm:$0xff] }
  0x15   :  { %v99_v8 = vld [vmem:[#allocation2 + $0x8] sm:$0xff] }
  0x91   :  { %v92_v9 = vpop.f32.mrf.mxu0  ;;  %v95_v10 = vpop.f32.mrf.mxu1 }
  0x92   :  { %v100_v11 = vadd.f32 %v98_v7, %v92_v9  ;;  %v101_v12 = vadd.f32 %v99_v8, %v95_v10 }
  0x94   :  { %102 = vst.msk [vmem:[#allocation2] sm:$0xff] %vm59_vm0, %v100_v11 }
  0x95   :  { %103 = vst.msk [vmem:[#allocation2 + $0x8] sm:$0xff] %vm59_vm0, %v101_v12 }
  0x9b   :  { %v106_v14 = vld [vmem:[#allocation2] sm:$0xff] }
  0x9c   :  { %v112_v15 = vadd.f32 %v246_v13, %v106_v14  ;;  %v107_v16 = vld [vmem:[#allocation2 + $0x8] sm:$0xff] }
  0x9d   :  { %v113_v18 = vadd.f32 %v246_v13, %v107_v16 }
  0x9e   :  { %v114_v17 = vsel %vm59_vm0, %v112_v15, 0.0 }
  0x9f   :  { %115 = vadd.xlane.f32.xlu0 %v114_v17  ;;  %v117_v19 = vsel %vm59_vm0, %v113_v18, 0.0 }
  0xa7   :  { %118 = vadd.xlane.f32.xlu0 %v117_v19 }
 0x112   :  { %v116_v20 = vpop.xlane.xlu0 %115 }
 0x113   :  { %v120_v21 = vmul.f32 0.03125, %v116_v20 }
 0x115   :  { %v122_v22 = vsub.f32 %v112_v15, %v120_v21 }
 0x117   :  { %v124_v23 = vmul.f32 %v122_v22, %v122_v22 }
 0x119   :  { %v126_v24 = vsel %vm59_vm0, %v124_v23, 0.0 }
 0x11a   :  { %127 = vadd.xlane.f32.xlu1 %v126_v24  ;;  %v119_v25 = vpop.xlane.xlu0 %118 }
 0x11b   :  { %v121_v26 = vmul.f32 0.03125, %v119_v25 }
 0x11d   :  { %v123_v27 = vsub.f32 %v113_v18, %v121_v26 }
 0x11f   :  { %v125_v28 = vmul.f32 %v123_v27, %v123_v27 }
 0x121   :  { %v129_v29 = vsel %vm59_vm0, %v125_v28, 0.0 }
 0x122   :  { %130 = vadd.xlane.f32.xlu1 %v129_v29 }
 0x18d   :  { %v128_v30 = vpop.xlane.xlu1 %127 }
 0x18e   :  { %v132_v31 = vmul.f32 0.03125, %v128_v30 }
 0x190   :  { %v134_v32 = vmax.f32 %v132_v31, 0.0 }
 0x192   :  { %v136_v33 = vadd.f32 1e-05, %v134_v32 }
 0x194   :  { %249 = vrsqrt.f32 %v136_v33  ;;  %vm144_vm2 = vweird.f32 %v136_v33 }
 0x195   :  { %v131_v34 = vpop.xlane.xlu1 %130 }
 0x196   :  { %v133_v35 = vmul.f32 0.03125, %v131_v34 }
 0x198   :  { %v135_v36 = vmax.f32 %v133_v35, 0.0 }
 0x19a   :  { %v250_v37 = vpop.eup %249  ;;  %v137_v38 = vadd.f32 1e-05, %v135_v36 }
 0x19b   :  { %v139_v39 = vmul.f32 %v250_v37, %v136_v33  ;;  %vm145_vm1 = vweird.f32 %v250_v37 }
 0x19c   :  { %251 = vrsqrt.f32 %v137_v38  ;;  %vm146_vm3 = vmor %vm144_vm2, %vm145_vm1  ;;  %vm154_vm5 = vweird.f32 %v137_v38 }
 0x19d   :  { %v140_v40 = vmul.f32 %v250_v37, %v139_v39 }
 0x19f   :  { %v141_v41 = vmul.f32 0.5, %v140_v40 }
 0x1a1   :  { %v142_v42 = vsub.f32 1.5, %v141_v41 }
 0x1a2   :  { %v252_v43 = vpop.eup %251 }
 0x1a3   :  { %v143_v44 = vmul.f32 %v250_v37, %v142_v42  ;;  %v149_v45 = vmul.f32 %v252_v43, %v137_v38  ;;  %vm155_vm4 = vweird.f32 %v252_v43 }
 0x1a4   :  { %vm156_vm6 = vmor %vm154_vm5, %vm155_vm4 }
 0x1a5   :  { %v147_v47 = vsel %vm146_vm3, %v250_v37, %v143_v44  ;;  %v150_v48 = vmul.f32 %v252_v43, %v149_v45 }
 0x1a6   :  { %v159_v50 = vmul.f32 %v147_v47, %v122_v22 }
 0x1a7   :  { %v151_v51 = vmul.f32 0.5, %v150_v48 }
 0x1a8   :  { %v164_v52 = vmul.f32 %v247_v46, %v159_v50 }
 0x1a9   :  { %v152_v53 = vsub.f32 1.5, %v151_v51 }
 0x1aa   :  { %v170_v54 = vadd.f32 %v248_v49, %v164_v52 }
 0x1ab   :  { %v153_v55 = vmul.f32 %v252_v43, %v152_v53 }
 0x1ac   :  { %v234_v56 = vmul.f32 -1.442695, %v170_v54 }
 0x1ad   :  { %v157_v57 = vsel %vm156_vm6, %v252_v43, %v153_v55 }
 0x1ae   :  { %253 = vpow2.f32 %v234_v56  ;;  %v160_v58 = vmul.f32 %v157_v57, %v123_v27 }
 0x1b0   :  { %v165_v59 = vmul.f32 %v247_v46, %v160_v58 }
 0x1b2   :  { %v171_v60 = vadd.f32 %v248_v49, %v165_v59 }
 0x1b4   :  { %v254_v61 = vpop.eup %253  ;;  %v235_v62 = vmul.f32 -1.442695, %v171_v60 }
 0x1b5   :  { %v178_v63 = vadd.f32 1.0, %v254_v61 }
 0x1b6   :  { %255 = vpow2.f32 %v235_v62 }
 0x1b7   :  { %257 = vrcp.f32 %v178_v63  ;;  %v191_v5 = vand.u32 2147483648, %v178_v63  ;;  %v189_v7 = vand.u32 2147483647, %v178_v63  ;;  %vm185_vm8 = vweird.f32 %v178_v63 }
 0x1b9   :  { %v192_v10 = vor.u32 1.1754944e-38, %v191_v5  ;;  %vm190_vm10 = vcmp.eq.f32.partialorder %v189_v7, 8.507059e+37 }
 0x1bc   :  { %v256_v0 = vpop.eup %255 }
 0x1bd   :  { %v258_v1 = vpop.eup %257  ;;  %v179_v2 = vadd.f32 1.0, %v256_v0 }
 0x1be   :  { %v181_v3 = vmul.f32 %v258_v1, %v178_v63  ;;  %vm186_vm7 = vweird.f32 %v258_v1 }
 0x1bf   :  { %259 = vrcp.f32 %v179_v2  ;;  %vm187_vm9 = vmor %vm185_vm8, %vm186_vm7  ;;  %v206_v15 = vand.u32 2147483648, %v179_v2  ;;  %v204_v17 = vand.u32 2147483647, %v179_v2  ;;  %vm200_vm12 = vweird.f32 %v179_v2 }
 0x1c0   :  { %v182_v4 = vsub.f32 1.0, %v181_v3 }
 0x1c1   :  { %v207_v19 = vor.u32 1.1754944e-38, %v206_v15  ;;  %vm205_vm14 = vcmp.eq.f32.partialorder %v204_v17, 8.507059e+37 }
 0x1c2   :  { %v183_v6 = vmul.f32 %v258_v1, %v182_v4 }
 0x1c4   :  { %v184_v8 = vadd.f32 %v258_v1, %v183_v6 }
 0x1c5   :  { %v260_v9 = vpop.eup %259 }
 0x1c6   :  { %v188_v11 = vsel %vm187_vm9, %v258_v1, %v184_v8  ;;  %v196_v12 = vmul.f32 %v260_v9, %v179_v2  ;;  %vm201_vm11 = vweird.f32 %v260_v9 }
 0x1c7   :  { %v193_v13 = vsel %vm190_vm10, %v192_v10, %v188_v11  ;;  %vm202_vm13 = vmor %vm200_vm12, %vm201_vm11 }
 0x1c8   :  { %v197_v14 = vsub.f32 1.0, %v196_v12  ;;  %210 = vst.msk [vmem:[#allocation8] sm:$0xff] %vm59_vm0, %v193_v13 }
 0x1ca   :  { %v198_v16 = vmul.f32 %v260_v9, %v197_v14 }
 0x1cc   :  { %v199_v18 = vadd.f32 %v260_v9, %v198_v16 }
 0x1ce   :  { %v203_v20 = vsel %vm202_vm13, %v260_v9, %v199_v18 }
 0x1cf   :  { %v208_v21 = vsel %vm205_vm14, %v207_v19, %v203_v20 }
 0x1d0   :  { %211 = vst.msk [vmem:[#allocation8 + $0x8] sm:$0xff] %vm59_vm0, %v208_v21 }
 0x1d1   :  { %224 = dma.vmem_to_hbm [thread:$0]  %s217_s4, 256, %s219_s10, [#allocation5], %s340_s26, %s340_s26, %s341_s27  }
 0x1d2   :  { %337 = dma.done.wait [#allocation5], 256  }
 0x1d3   :  { %338 = vsyncadd [#allocation5], 4294967040 }
 0x1d4   :  { %229 = vsyncpa [#allocation4], 1 }
 0x1d5   :  { %230 = vsyncpa [#allocation7], 1 }
 0x1d6   :  { %231 = vsyncpa [#allocation5], 1 }

</bundles_post_ra>
